<compile_context>
chip_gen: v5e
topology: v5e:2x2
jax: 0.10.0
libtpu: 0.0.40
codegen_flags: <defaults>
</compile_context>

<pallas_src>
import functools
import math

import jax
import jax.numpy as jnp
from jax import lax
from jax.experimental import pallas as pl
from jax.experimental.pallas import tpu as pltpu


def _round_up(x: int, m: int) -> int:
    return ((x + m - 1) // m) * m


# Per-block VMEM budget (~3 MiB).  With double-buffered input + two outputs this
# stays well inside v5e's 16 MiB and v7x's 32 MiB default scoped-VMEM limits
# without touching vmem_limit_bytes.
_VMEM_BLOCK_BUDGET = 3 * 1024 * 1024


# --------------------------------------------------------------------------
# Normalize(power) kernels
# --------------------------------------------------------------------------

def _l2norm_rows_kernel(x_ref, o_ref, *, power):
    # Block (TILE_R, D): reduction runs along the last (lane) axis -> lane-dense
    # loads/stores, reduction handled by the XLU.
    x = x_ref[...]
    if x.dtype != jnp.float32:
        x = x.astype(jnp.float32)
    if power == 2:
        s = jnp.sum(x * x, axis=-1, keepdims=True)
        o = x * lax.rsqrt(s)
    else:  # generic fallback (not hit for the default power=2 module)
        s = jnp.sum(jnp.power(x, power), axis=-1, keepdims=True)
        o = x * jnp.power(s, -1.0 / power)
    o_ref[...] = o.astype(o_ref.dtype)


def _l2norm_spatial_kernel(x_ref, o_ref, *, power):
    # Block (PRE_TILE, red, TILE_POST): reduce over the channel axis (axis=1),
    # lanes carry the fused spatial axis.
    x = x_ref[...]
    if x.dtype != jnp.float32:
        x = x.astype(jnp.float32)
    if power == 2:
        s = jnp.sum(x * x, axis=1, keepdims=True)
        o = x * lax.rsqrt(s)
    else:
        s = jnp.sum(jnp.power(x, power), axis=1, keepdims=True)
        o = x * jnp.power(s, -1.0 / power)
    o_ref[...] = o.astype(o_ref.dtype)


def normalize(x, dim: int = 1, power: int = 2):
    """Pallas equivalent of Normalize(power)(x, dim):
       out = x / x.pow(power).sum(dim, keepdim=True).pow(1/power)."""
    shape = x.shape
    if dim < 0:
        dim += len(shape)
    pre = int(math.prod(shape[:dim])) if dim > 0 else 1
    red = int(shape[dim])
    post = int(math.prod(shape[dim + 1:])) if dim + 1 < len(shape) else 1
    itemsize = jnp.dtype(x.dtype).itemsize

    if post == 1:
        # (B, D)-style input normalized along its last axis: lane-dense layout.
        x2 = x.reshape(pre, red)
        red_p = _round_up(red, 128)              # zero-pad lanes (exact: 0^p adds 0)
        tile_r = min(_round_up(pre, 8), 256)
        while tile_r > 8 and tile_r * red_p * itemsize > _VMEM_BLOCK_BUDGET:
            tile_r //= 2
        tile_r = max(8, (tile_r // 8) * 8)
        pre_p = _round_up(pre, tile_r)
        xp = jnp.pad(x2, ((0, pre_p - pre), (0, red_p - red)))
        out = pl.pallas_call(
            functools.partial(_l2norm_rows_kernel, power=power),
            out_shape=jax.ShapeDtypeStruct((pre_p, red_p), x.dtype),
            grid=(pre_p // tile_r,),
            in_specs=[pl.BlockSpec((tile_r, red_p), lambda i: (i, 0))],
            out_specs=pl.BlockSpec((tile_r, red_p), lambda i: (i, 0)),
            compiler_params=pltpu.CompilerParams(
                dimension_semantics=("parallel",)),
        )(xp)
        return out[:pre, :red].reshape(shape)

    # Feature-map style: (pre, red, post) with reduction on the middle axis.
    x3 = x.reshape(pre, red, post)
    tile_post = 128
    for cand in (2048, 1024, 512, 256, 128):
        if cand <= _round_up(post, 128) and red * cand * itemsize <= _VMEM_BLOCK_BUDGET:
            tile_post = cand
            break
    post_p = _round_up(post, tile_post)          # 128-aligned, unmasked stores
    # Pack several `pre` rows per block when the channel count is small.
    pre_tile = max(1, min(pre, 8,
                          _VMEM_BLOCK_BUDGET // max(1, red * tile_post * itemsize)))
    pre_p = _round_up(pre, pre_tile)
    xp = jnp.pad(x3, ((0, pre_p - pre), (0, 0), (0, post_p - post)))
    out = pl.pallas_call(
        functools.partial(_l2norm_spatial_kernel, power=power),
        out_shape=jax.ShapeDtypeStruct((pre_p, red, post_p), x.dtype),
        grid=(pre_p // pre_tile, post_p // tile_post),
        in_specs=[pl.BlockSpec((pre_tile, red, tile_post), lambda i, j: (i, 0, j))],
        out_specs=pl.BlockSpec((pre_tile, red, tile_post), lambda i, j: (i, 0, j)),
        compiler_params=pltpu.CompilerParams(
            dimension_semantics=("parallel", "parallel")),
    )(xp)
    return out[:pre, :, :post].reshape(shape)


# --------------------------------------------------------------------------
# Fused adaptive-avg-pool + linear (no bias) + L2-normalize  (the ICModel tail)
# --------------------------------------------------------------------------

def _pool_linear_l2norm_kernel(fm_ref, w_ref, logits_ref, l2_ref, *, inv_hw):
    # fm block: (TILE_B, C_p, HW_p) — spatial axis on lanes, channel on sublanes.
    x = fm_ref[...]
    if x.dtype != jnp.float32:
        x = x.astype(jnp.float32)
    # Global average pool: lane-axis sum (XLU) * 1/HW; zero lane-padding is exact.
    feat = jnp.sum(x, axis=-1) * inv_hw                       # (TILE_B, C_p)
    w = w_ref[...]
    if w.dtype != jnp.float32:
        w = w.astype(jnp.float32)
    logits = jnp.dot(feat, w, preferred_element_type=jnp.float32)  # (TILE_B, DOUT_p)
    s = jnp.sum(logits * logits, axis=-1, keepdims=True)
    inv = lax.rsqrt(s)
    logits_ref[...] = logits.astype(logits_ref.dtype)
    l2_ref[...] = (logits * inv).astype(l2_ref.dtype)


def avgpool_linear_l2norm(fm, weight):
    """Fused: feat = mean(fm, (2,3)); logits = feat @ weight.T;
              l2 = logits / ||logits||_2 (dim=1). Returns (logits, l2)."""
    B, C, H, W = fm.shape
    HW = H * W
    dout = weight.shape[0]
    itemsize = jnp.dtype(fm.dtype).itemsize

    c_p = _round_up(C, 8)            # sublane alignment for the 3-D block
    hw_p = _round_up(HW, 128)        # lane alignment (zero pad -> exact sum)
    dout_p = _round_up(dout, 128)    # lane-dense output stores

    tile_b = min(_round_up(B, 8), 256)
    while tile_b > 8 and tile_b * c_p * hw_p * itemsize > _VMEM_BLOCK_BUDGET:
        tile_b //= 2
    tile_b = max(8, (tile_b // 8) * 8)
    b_p = _round_up(B, tile_b)

    fm_p = jnp.pad(fm.reshape(B, C, HW),
                   ((0, b_p - B), (0, c_p - C), (0, hw_p - HW)))
    w_p = jnp.pad(weight.T, ((0, c_p - C), (0, dout_p - dout))).astype(fm.dtype)

    logits, l2 = pl.pallas_call(
        functools.partial(_pool_linear_l2norm_kernel, inv_hw=1.0 / float(HW)),
        out_shape=(jax.ShapeDtypeStruct((b_p, dout_p), fm.dtype),
                   jax.ShapeDtypeStruct((b_p, dout_p), fm.dtype)),
        grid=(b_p // tile_b,),
        in_specs=[pl.BlockSpec((tile_b, c_p, hw_p), lambda i: (i, 0, 0)),
                  pl.BlockSpec((c_p, dout_p), lambda i: (0, 0))],
        out_specs=(pl.BlockSpec((tile_b, dout_p), lambda i: (i, 0)),
                   pl.BlockSpec((tile_b, dout_p), lambda i: (i, 0))),
        compiler_params=pltpu.CompilerParams(
            dimension_semantics=("parallel",)),
    )(fm_p, w_p)
    return logits[:B, :dout], l2[:B, :dout]


# --------------------------------------------------------------------------
# ICModel forward (conv stack in lax, Pallas for pool + linear + l2norm tail)
# --------------------------------------------------------------------------

def init_ic_model(key, in_dim, out_dim):
    ks = jax.random.split(key, 5)
    s_conv = 1.0 / math.sqrt(in_dim * 9)
    s_lin = 1.0 / math.sqrt(in_dim)
    return {
        "conv1_w": jax.random.uniform(ks[0], (in_dim, in_dim, 3, 3), jnp.float32, -s_conv, s_conv),
        "conv1_b": jax.random.uniform(ks[1], (in_dim,), jnp.float32, -s_conv, s_conv),
        "conv2_w": jax.random.uniform(ks[2], (in_dim, in_dim, 3, 3), jnp.float32, -s_conv, s_conv),
        "conv2_b": jax.random.uniform(ks[3], (in_dim,), jnp.float32, -s_conv, s_conv),
        "bn1_gamma": jnp.ones((in_dim,), jnp.float32), "bn1_beta": jnp.zeros((in_dim,), jnp.float32),
        "bn1_mean": jnp.zeros((in_dim,), jnp.float32), "bn1_var": jnp.ones((in_dim,), jnp.float32),
        "bn2_gamma": jnp.ones((in_dim,), jnp.float32), "bn2_beta": jnp.zeros((in_dim,), jnp.float32),
        "bn2_mean": jnp.zeros((in_dim,), jnp.float32), "bn2_var": jnp.ones((in_dim,), jnp.float32),
        "linear_w": jax.random.uniform(ks[4], (out_dim, in_dim), jnp.float32, -s_lin, s_lin),
    }


def _conv_bn_relu_pool(x, w, b, gamma, beta, mean, var, eps=1e-5):
    y = lax.conv_general_dilated(x, w, window_strides=(1, 1), padding="VALID",
                                 dimension_numbers=("NCHW", "OIHW", "NCHW"))
    y = y + b[None, :, None, None]
    scale = (gamma * lax.rsqrt(var + eps))[None, :, None, None]
    y = (y - mean[None, :, None, None]) * scale + beta[None, :, None, None]
    y = jnp.maximum(y, 0.0)
    y = lax.reduce_window(y, -jnp.inf, lax.max,
                          window_dimensions=(1, 1, 2, 2),
                          window_strides=(1, 1, 2, 2), padding="VALID")
    return y


def ic_model_feature_map(params, x):
    # TODO(synk): Conv2d / BatchNorm(eval running stats) / ReLU / MaxPool stages
    # are expressed with lax ops (left to XLA); Pallas covers the fused
    # avg-pool + linear + L2-norm tail.
    out = _conv_bn_relu_pool(x, params["conv1_w"], params["conv1_b"],
                             params["bn1_gamma"], params["bn1_beta"],
                             params["bn1_mean"], params["bn1_var"])
    out = _conv_bn_relu_pool(out, params["conv2_w"], params["conv2_b"],
                             params["bn2_gamma"], params["bn2_beta"],
                             params["bn2_mean"], params["bn2_var"])
    return out                                    # (B, C, H', W')


def ic_model_forward(params, x):
    fmap = ic_model_feature_map(params, x)
    # Fused Pallas tail: adaptive_avg_pool2d(.,1) + view + linear + l2norm.
    return avgpool_linear_l2norm(fmap, params["linear_w"])   # (out_logits, out_l2norm)


# --------------------------------------------------------------------------

if __name__ == "__main__":
    key = jax.random.PRNGKey(0)
    kx, kp, kfm = jax.random.split(key, 3)

    in_dim, out_dim = 4, 32
    x = jax.random.normal(kx, (2, in_dim, 16, 16), dtype=jnp.float32)
    params = init_ic_model(kp, in_dim, out_dim)

    logits, l2 = jax.block_until_ready(ic_model_forward(params, x))
    assert logits.shape == (2, out_dim) and l2.shape == (2, out_dim)
    assert logits.dtype == x.dtype and l2.dtype == x.dtype

    # Reference for the fused Pallas tail (avg-pool + linear + L2-norm).
    fmap = ic_model_feature_map(params, x)
    feat = jnp.mean(fmap, axis=(2, 3))
    logits_ref = jnp.dot(feat, params["linear_w"].T, precision=lax.Precision.HIGHEST)
    l2_ref = logits_ref / jnp.sqrt(jnp.sum(logits_ref * logits_ref, axis=1, keepdims=True))
    assert jnp.allclose(logits, logits_ref, atol=1e-2, rtol=1e-2)
    assert jnp.allclose(l2, l2_ref, atol=1e-2, rtol=1e-2)

    # Standalone Normalize kernel: lane-dense rows path ((B, D) logits, dim=1).
    l2_rows = jax.block_until_ready(normalize(logits_ref, dim=1, power=2))
    assert jnp.allclose(l2_rows, l2_ref, atol=1e-5, rtol=1e-5)

    # Standalone Normalize kernel: tiled feature-map path (channel dim of NCHW).
    fm = jax.random.normal(kfm, (2, in_dim, 16, 16), dtype=jnp.float32)
    out_fm = jax.block_until_ready(normalize(fm, dim=1, power=2))
    ref_fm = fm / jnp.sqrt(jnp.sum(fm * fm, axis=1, keepdims=True))
    assert jnp.allclose(out_fm, ref_fm, atol=1e-5, rtol=1e-5)

    print("KERNEL_OK")
</pallas_src>

<mosaic_0001>
module attributes {stable_mosaic.version = 11 : i64} {
  func.func @_pool_linear_l2norm_kernel(%arg0: i32, %arg1: memref<8x8x128xf32, #tpu.memory_space<vmem>>, %arg2: memref<8x128xf32, #tpu.memory_space<vmem>>, %arg3: memref<8x128xf32, #tpu.memory_space<vmem>>, %arg4: memref<8x128xf32, #tpu.memory_space<vmem>>) attributes {dimension_semantics = [#tpu.dimension_semantics<parallel>], iteration_bounds = array<i64: 1>, scalar_prefetch = 0 : i64, scratch_operands = 0 : i64, tpu.core_type = #tpu.core_type<tc>, window_params = [{transform_indices = @transform_0, window_bounds = array<i64: 8, 8, 128>}, {pipeline_mode = #tpu.pipeline_mode<synchronous>, transform_indices = @transform_1, window_bounds = array<i64: 8, 128>}, {transform_indices = @transform_2, window_bounds = array<i64: 8, 128>}, {transform_indices = @transform_3, window_bounds = array<i64: 8, 128>}]} {
    %c0 = arith.constant 0 : index
    %c0_0 = arith.constant 0 : index
    %c0_1 = arith.constant 0 : index
    %0 = vector.load %arg1[%c0, %c0_0, %c0_1] : memref<8x8x128xf32, #tpu.memory_space<vmem>>, vector<8x8x128xf32>
    %cst = arith.constant dense<0.000000e+00> : vector<8x8xf32>
    %1 = vector.multi_reduction <add>, %0, %cst [2] : vector<8x8x128xf32> to vector<8x8xf32>
    %cst_2 = arith.constant 2.500000e-01 : f32
    %2 = vector.broadcast %cst_2 : f32 to vector<8x8xf32>
    %3 = arith.mulf %1, %2 : vector<8x8xf32>
    %c0_3 = arith.constant 0 : index
    %c0_4 = arith.constant 0 : index
    %4 = vector.load %arg2[%c0_3, %c0_4] : memref<8x128xf32, #tpu.memory_space<vmem>>, vector<8x128xf32>
    %cst_5 = arith.constant dense<0.000000e+00> : vector<8x128xf32>
    %5 = tpu.matmul %3, %4, %cst_5 {dimension_numbers = #tpu.dot_dimension_numbers<[1], [0], [0], [1], [0, 0, 1, 1], [], []>} : vector<8x8xf32>, vector<8x128xf32>, vector<8x128xf32> -> vector<8x128xf32>
    %6 = arith.mulf %5, %5 : vector<8x128xf32>
    %cst_6 = arith.constant dense<0.000000e+00> : vector<8xf32>
    %7 = vector.multi_reduction <add>, %6, %cst_6 [1] : vector<8x128xf32> to vector<8xf32>
    %8 = vector.shape_cast %7 : vector<8xf32> to vector<8x1xf32>
    %9 = math.rsqrt %8 : vector<8x1xf32>
    %c0_7 = arith.constant 0 : index
    %c0_8 = arith.constant 0 : index
    %10 = vector.load %arg3[%c0_7, %c0_8] : memref<8x128xf32, #tpu.memory_space<vmem>>, vector<8x128xf32>
    tpu.vector_store %arg3[%c0_7, %c0_8], %5 {strides = array<i32>} : memref<8x128xf32, #tpu.memory_space<vmem>>, vector<8x128xf32>,
    %11 = vector.broadcast %9 : vector<8x1xf32> to vector<8x128xf32>
    %12 = arith.mulf %5, %11 : vector<8x128xf32>
    %c0_9 = arith.constant 0 : index
    %c0_10 = arith.constant 0 : index
    %13 = vector.load %arg4[%c0_9, %c0_10] : memref<8x128xf32, #tpu.memory_space<vmem>>, vector<8x128xf32>
    tpu.vector_store %arg4[%c0_9, %c0_10], %12 {strides = array<i32>} : memref<8x128xf32, #tpu.memory_space<vmem>>, vector<8x128xf32>,
    return
  }
  func.func @transform_0(%arg0: i32) -> (i32, i32, i32) {
    %c0_i32 = arith.constant 0 : i32
    %c0_i32_0 = arith.constant 0 : i32
    %c0_i32_1 = arith.constant 0 : i32
    return %arg0, %c0_i32, %c0_i32_0 : i32, i32, i32
  }
  func.func @transform_1(%arg0: i32) -> (i32, i32) {
    %c0_i32 = arith.constant 0 : i32
    %c0_i32_0 = arith.constant 0 : i32
    %c0_i32_1 = arith.constant 0 : i32
    return %c0_i32, %c0_i32_0 : i32, i32
  }
  func.func @transform_2(%arg0: i32) -> (i32, i32) {
    %c0_i32 = arith.constant 0 : i32
    %c0_i32_0 = arith.constant 0 : i32
    return %arg0, %c0_i32 : i32, i32
  }
  func.func @transform_3(%arg0: i32) -> (i32, i32) {
    %c0_i32 = arith.constant 0 : i32
    %c0_i32_0 = arith.constant 0 : i32
    return %arg0, %c0_i32 : i32, i32
  }
}

</mosaic_0001>

<bundles_post_ra>
// kernel: tpu_custom_call.1
= control target key start
LH: loop header
LB: loop body
LE: loop exit
PB: predicated region body
PF: predicated region fallthrough
CT: control target
= control target key end

     0   :  { %9 = vsyncpa [#allocation3], 0  ;;  %s334_s0 = inlined_call_operand.hbm [shape: f32[8,8,128], index: 0, kind: input, shape index: {}]   ;;  %s335_s1 = inlined_call_operand.hbm [shape: f32[8,128], index: 1, kind: input, shape index: {}]   ;;  %s336_s2 = inlined_call_operand.hbm [shape: f32[8,128], index: 2, kind: output, shape index: {0}]   ;;  %s337_s3 = inlined_call_operand.hbm [shape: f32[8,128], index: 3, kind: output, shape index: {1}]  }
   0x1   :  { %10 = vsyncpa [#allocation6], 0 }
   0x2   :  { %11 = vsyncpa [#allocation4], 0 }
   0x3   :  { %12 = vsyncpa [#allocation9], 0  ;;  %s17_s14 = sshll.u32 %s334_s0, 4  ;;  %s296_s15 = smov [#allocation2]   ;;  %s18_s14 = int_to_ptr.hbm [resolvable:$true] %s17_s14 }
   0x4   :  { %s19_s16 = sshll.u32 %s296_s15, 4  ;;  %s31_s19 = sshll.u32 %s335_s1, 4  ;;  %s20_s16 = int_to_ptr.vmem [resolvable:$true] %s19_s16  ;;  %s32_s19 = int_to_ptr.hbm [resolvable:$true] %s31_s19 }
   0x5   :  { %s297_s20 = smov 128   ;;  %s298_s21 = smov 8  }
   0x6   :  { %25 = dma.hbm_to_vmem [thread:$0]  %s18_s14, 1024, %s20_s16, [#allocation3], %s297_s20, %s297_s20, %s298_s21  }
   0x7   :  { %s299_s22 = smov [#allocation5]  }
   0x8   :  { %s33_s23 = sshll.u32 %s299_s22, 4  ;;  %s34_s23 = int_to_ptr.vmem [resolvable:$true] %s33_s23 }
   0x9   :  { %36 = dma.hbm_to_vmem [thread:$0]  %s32_s19, 128, %s34_s23, [#allocation6]  }
   0xa   :  { %288 = dma.done.wait [#allocation3], 1024  }
   0xb   :  { %289 = vsyncadd [#allocation3], 4294966272 }
   0xc   :  { %290 = dma.done.wait [#allocation6], 128  }
   0xd   :  { %291 = vsyncadd [#allocation6], 4294967168  ;;  %v45_v0 = vld [vmem:[#allocation2] sm:$0xff]  ;;  %v47_v1 = vld [vmem:[#allocation2 + $0x10] sm:$0xff]  ;;  %v86_v12 = vlaneseq  ;;  %vm96_vm0 = vcmask 1041409   ;;  %vm98_vm1 = vcmask 1042434  }
   0xe   :  { %v49_v2 = vld [vmem:[#allocation2 + $0x20] sm:$0xff]  ;;  %53 = vadd.xlane.f32.xlu0 %v45_v0  ;;  %57 = vadd.xlane.f32.xlu1 %v47_v1  ;;  %v46_v3 = vld [vmem:[#allocation2 + $0x8] sm:$0xff]  ;;  %v48_v4 = vld [vmem:[#allocation2 + $0x18] sm:$0xff]  ;;  %vm100_vm2 = vcmask 1043459   ;;  %vm102_vm3 = vcmask 1044484   ;;  %vm104_vm4 = vcmask 1045509  }
   0xf   :  { %61 = vadd.xlane.f32.xlu2 %v49_v2  ;;  %v50_v5 = vld [vmem:[#allocation2 + $0x28] sm:$0xff]  ;;  %v51_v6 = vld [vmem:[#allocation2 + $0x30] sm:$0xff]  ;;  %v52_v7 = vld [vmem:[#allocation2 + $0x38] sm:$0xff]  ;;  %v87_v13 = vand.u32 127, %v86_v12  ;;  %vm106_vm5 = vcmask 1046534   ;;  %vm108_vm6 = vcmask 1047559  }
  0x10   :  { %v77_v8 = vld [vmem:[#allocation5] sm:$0xff]  ;;  %vm110_vm7 = vcmask 64512   ;;  %s156_s24 = sshll.u32 %s336_s2, 4  ;;  %s300_s25 = smov [#allocation7]   ;;  %s157_s24 = int_to_ptr.hbm [resolvable:$true] %s156_s24 }
  0x11   :  { %128 = vmatpush.msra.mxu0 %v77_v8  ;;  %s154_s26 = sshll.u32 %s300_s25, 4  ;;  %s301_s27 = smov [#allocation8]   ;;  %s155_s26 = int_to_ptr.vmem [resolvable:$true] %s154_s26 }
  0x12   :  { %s165_s28 = sshll.u32 %s301_s27, 4  ;;  %s167_s2 = sshll.u32 %s337_s3, 4  ;;  %s166_s28 = int_to_ptr.vmem [resolvable:$true] %s165_s28  ;;  %s168_s2 = int_to_ptr.hbm [resolvable:$true] %s167_s2 }
  0x16   :  { %55 = vadd.xlane.f32.xlu0 %v46_v3  ;;  %59 = vadd.xlane.f32.xlu1 %v48_v4 }
  0x17   :  { %63 = vadd.xlane.f32.xlu2 %v50_v5 }
  0x1e   :  { %65 = vadd.xlane.f32.xlu0 %v51_v6  ;;  %67 = vadd.xlane.f32.xlu1 %v52_v7 }
  0x81   :  { %v54_v9 = vpop.xlane.xlu0 %53  ;;  %v58_v10 = vpop.xlane.xlu1 %57 }
  0x82   :  { %v62_v11 = vpop.xlane.xlu2 %61  ;;  %v69_v14 = vmul.f32 0.25, %v54_v9  ;;  %v71_v15 = vmul.f32 0.25, %v58_v10 }
  0x83   :  { %v73_v22 = vmul.f32 0.25, %v62_v11 }
  0x84   :  { %v88_v21 = vperm.slane %v69_v14, %v87_v13  ;;  %v90_v25 = vperm.slane %v71_v15, %v87_v13 }
  0x85   :  { %v92_v29 = vperm.slane %v73_v22, %v87_v13 }
  0x89   :  { %v56_v16 = vpop.xlane.xlu0 %55  ;;  %v60_v17 = vpop.xlane.xlu1 %59 }
  0x8a   :  { %v70_v18 = vmul.f32 0.25, %v56_v16  ;;  %v72_v19 = vmul.f32 0.25, %v60_v17  ;;  %v64_v20 = vpop.xlane.xlu2 %63 }
  0x8b   :  { %v74_v26 = vmul.f32 0.25, %v64_v20 }
  0x8c   :  { %v89_v23 = vperm.slane %v70_v18, %v87_v13  ;;  %v91_v24 = vperm.slane %v72_v19, %v87_v13 }
  0x8d   :  { %v93_v31 = vperm.slane %v74_v26, %v87_v13 }
  0x8e   :  { %v97_v27 = vsel %vm96_vm0, %v89_v23, %v88_v21 }
  0x8f   :  { %v99_v28 = vsel %vm98_vm1, %v90_v25, %v97_v27 }
  0x90   :  { %v101_v30 = vsel %vm100_vm2, %v91_v24, %v99_v28 }
  0x91   :  { %v66_v32 = vpop.xlane.xlu0 %65  ;;  %v68_v33 = vpop.xlane.xlu1 %67  ;;  %v103_v36 = vsel %vm102_vm3, %v92_v29, %v101_v30 }
  0x92   :  { %v75_v34 = vmul.f32 0.25, %v66_v32  ;;  %v76_v35 = vmul.f32 0.25, %v68_v33  ;;  %v105_v39 = vsel %vm104_vm4, %v93_v31, %v103_v36 }
  0x94   :  { %v94_v37 = vperm.slane %v75_v34, %v87_v13  ;;  %v95_v38 = vperm.slane %v76_v35, %v87_v13 }
  0x96   :  { %v107_v40 = vsel %vm106_vm5, %v94_v37, %v105_v39 }
  0x97   :  { %v109_v41 = vsel %vm108_vm6, %v95_v38, %v107_v40 }
  0x98   :  { %183 = vmatmul.msk.f32.vlgmr.msra.gmra.mxu0 %vm110_vm7, %v109_v41 }
 0x115   :  { %v130_v42 = vpop.f32.mrf.mxu0 }
 0x116   :  { %146 = vst [vmem:[#allocation7] sm:$0xff] %v130_v42  ;;  %v133_v43 = vmul.f32 %v130_v42, %v130_v42 }
 0x117   :  { %159 = dma.vmem_to_hbm [thread:$0]  %s155_s26, 128, %s157_s24, [#allocation4]  }
 0x118   :  { %134 = vadd.xlane.f32.xlu2 %v133_v43 }
 0x18b   :  { %v135_v44 = vpop.xlane.xlu2 %134 }
 0x18c   :  { %190 = vrsqrt.f32 %v135_v44  ;;  %vm142_vm9 = vweird.f32 %v135_v44 }
 0x192   :  { %v191_v45 = vpop.eup %190 }
 0x193   :  { %v137_v46 = vmul.f32 %v191_v45, %v135_v44  ;;  %vm143_vm8 = vweird.f32 %v191_v45 }
 0x194   :  { %vm144_vm10 = vmor %vm142_vm9, %vm143_vm8 }
 0x195   :  { %v138_v47 = vmul.f32 %v191_v45, %v137_v46 }
 0x197   :  { %v139_v48 = vmul.f32 0.5, %v138_v47 }
 0x199   :  { %v140_v49 = vsub.f32 1.5, %v139_v48 }
 0x19b   :  { %v141_v50 = vmul.f32 %v191_v45, %v140_v49 }
 0x19d   :  { %v145_v51 = vsel %vm144_vm10, %v191_v45, %v141_v50 }
 0x19e   :  { %v147_v52 = vmul.f32 %v145_v51, %v130_v42 }
 0x1a0   :  { %148 = vst [vmem:[#allocation8] sm:$0xff] %v147_v52 }
 0x1a1   :  { %170 = dma.vmem_to_hbm [thread:$0]  %s166_s28, 128, %s168_s2, [#allocation9]  }
 0x1a2   :  { %292 = dma.done.wait [#allocation4], 128  }
 0x1a3   :  { %293 = vsyncadd [#allocation4], 4294967168 }
 0x1a4   :  { %294 = dma.done.wait [#allocation9], 128  }
 0x1a5   :  { %295 = vsyncadd [#allocation9], 4294967168 }
 0x1a6   :  { %179 = vsyncpa [#allocation3], 1 }
 0x1a7   :  { %180 = vsyncpa [#allocation6], 1 }
 0x1a8   :  { %181 = vsyncpa [#allocation4], 1 }
 0x1a9   :  { %182 = vsyncpa [#allocation9], 1 }

</bundles_post_ra>
